<compile_context>
chip_gen: v7x
topology: tpu7x:2x2x1
jax: 0.10.0
libtpu: 0.0.40
codegen_flags: <defaults>
</compile_context>

<pallas_src>
import functools

import jax
import jax.numpy as jnp
from jax.experimental import pallas as pl
from jax.experimental.pallas import tpu as pltpu

OBS_DIM = 4    # CartpoleV1 observation shape (4,)
H1 = 64
H2 = 30
NUM_ACT = 2    # CartpoleV1 num_act

_LANE = 128                     # lane width; batch tiles are multiples of this
_MAX_TB = 16384                 # per-tile batch cap (lane axis)
_MIN_GRID = 2                   # keep >=2 grid steps when possible (v7x megacore)
_MIN_PALLAS_BATCH = 1024        # below this, XLA fusion beats kernel launch cost
_VMEM_LIMIT = 32 * 1024 * 1024  # headroom for (64, TB) f32 intermediates


def _mlp_logits_kernel(x_ref, w1_ref, b1_ref, w2_ref, b2_ref, w3_ref, b3_ref,
                       o_ref):
    """One batch tile. x_ref: (OBS_DIM, TB) with the batch on the lane axis.

    Weights/biases arrive pre-folded (see _fold_params), so the body is just
    tanh(W z + b) twice plus a final affine — no per-element scale/shift.
    """
    x = x_ref[...]                                                  # (4, TB)
    w1 = w1_ref[...]                                                # (64, 4)

    # Layer 1 on the VPU: K = 4 is far too small to feed the MXU usefully.
    # 4 broadcast multiply-adds per (64, TB) output; co-issues with EUP tanh.
    z1 = b1_ref[...]                                                # (64, 1)
    for k in range(OBS_DIM):                                        # unrolled
        z1 = z1 + w1[:, k:k + 1] * x[k:k + 1, :]
    t1 = jnp.tanh(z1)                                               # (64, TB)

    # Layer 2 on the MXU (K = 64).
    z2 = jnp.dot(w2_ref[...], t1,
                 preferred_element_type=jnp.float32) + b2_ref[...]
    t2 = jnp.tanh(z2)                                               # (30, TB)

    # Layer 3: logits only; the dim=0 softmax couples every batch tile, so it
    # is applied outside the kernel (same jit) on the tiny (B, 2) logits.
    o_ref[...] = (jnp.dot(w3_ref[...], t2,
                          preferred_element_type=jnp.float32) + b3_ref[...])


def _fold_params(params):
    """Fold sigmoid(z) = 0.5*tanh(0.5 z) + 0.5 affine constants into the
    (tiny) weights/biases so the kernel computes tanh(W z + b) directly."""
    w1, b1, w2, b2, w3, b3 = params
    w1f = 0.5 * w1
    b1f = 0.5 * b1
    w2f = 0.25 * w2
    b2f = 0.5 * b2 + 0.25 * jnp.sum(w2, axis=1, keepdims=True)
    w3f = 0.5 * w3
    b3f = b3 + 0.5 * jnp.sum(w3, axis=1, keepdims=True)
    return w1f, b1f, w2f, b2f, w3f, b3f


def _plan_tiles(B):
    """Pick (tile_batch, padded_batch, grid_steps) for the lane (batch) axis.

    Pads only to 128 lanes (plus at most (g-1)*128 to even out tiles), keeps
    TB <= _MAX_TB, and keeps >= 2 grid steps when possible so v7x's second
    TensorCore isn't idle.
    """
    n_lanes = (B + _LANE - 1) // _LANE                      # 128-sample groups
    g = max(1, (n_lanes * _LANE + _MAX_TB - 1) // _MAX_TB)  # steps under cap
    g = max(g, min(_MIN_GRID, n_lanes))                     # megacore: >= 2
    g = min(g, n_lanes)                                     # no empty tiles
    tb_lanes = (n_lanes + g - 1) // g
    tb = tb_lanes * _LANE
    return tb, tb * g, g


def _reference_forward(x, params):
    """Pure-JAX module math (also the small-batch fast path)."""
    w1, b1, w2, b2, w3, b3 = params
    h1 = jax.nn.sigmoid(x @ w1.T + b1[:, 0])
    h2 = jax.nn.sigmoid(h1 @ w2.T + b2[:, 0])
    logits = h2 @ w3.T + b3[:, 0]
    return jax.nn.softmax(logits, axis=0)


@functools.partial(jax.jit, static_argnames=("force_pallas",))
def cartpole_forward(x, params, *, force_pallas=False):
    """x: (B, OBS_DIM) float32. Returns (B, NUM_ACT), softmax over dim=0."""
    B = x.shape[0]
    if B == 0:
        return jnp.zeros((0, NUM_ACT), jnp.float32)
    if not force_pallas and B < _MIN_PALLAS_BATCH:
        # One-tile grids are pure launch overhead for this tiny MLP.
        return _reference_forward(x, params)

    w1f, b1f, w2f, b2f, w3f, b3f = _fold_params(params)
    tb, b_pad, g = _plan_tiles(B)

    # Batch on the lane axis: (OBS_DIM, B_pad). Under this jit the pad fuses
    # with the transpose into a single layout pass.
    x_t = jnp.pad(x.T, ((0, 0), (0, b_pad - B)))

    const = lambda i: (0, 0)   # weights/biases: VMEM-resident across the grid

    logits_t = pl.pallas_call(
        _mlp_logits_kernel,
        out_shape=jax.ShapeDtypeStruct((NUM_ACT, b_pad), jnp.float32),
        grid_spec=pltpu.PrefetchScalarGridSpec(
            num_scalar_prefetch=0,
            grid=(g,),
            in_specs=[
                pl.BlockSpec((OBS_DIM, tb), lambda i: (0, i)),   # x tile
                pl.BlockSpec((H1, OBS_DIM), const),              # w1 (folded)
                pl.BlockSpec((H1, 1), const),                    # b1
                pl.BlockSpec((H2, H1), const),                   # w2
                pl.BlockSpec((H2, 1), const),                    # b2
                pl.BlockSpec((NUM_ACT, H2), const),              # w3
                pl.BlockSpec((NUM_ACT, 1), const),               # b3
            ],
            out_specs=pl.BlockSpec((NUM_ACT, tb), lambda i: (0, i)),
        ),
        compiler_params=pltpu.CompilerParams(
            dimension_semantics=("parallel",),
            vmem_limit_bytes=_VMEM_LIMIT),
    )(x_t, w1f, b1f, w2f, b2f, w3f, b3f)

    # Fused epilogue (same jit): drop padded columns, then softmax over dim=0
    # (the batch axis) across the FULL batch — identical to
    # torch.nn.Softmax(dim=0) applied to the (B, NUM_ACT) output.
    logits = logits_t[:, :B].T                                      # (B, 2)
    return jax.nn.softmax(logits, axis=0)


def init_params(key):
    """torch.nn.Linear-style init (U[-1/sqrt(fan_in), +1/sqrt(fan_in)]).

    Weights in torch-native (out, in) layout; biases as (out, 1) so they
    broadcast along the lane (batch) axis inside the kernel.
    """
    ks = jax.random.split(key, 6)

    def linear(kw, kb, fan_in, fan_out):
        bound = 1.0 / jnp.sqrt(float(fan_in))
        w = jax.random.uniform(kw, (fan_out, fan_in), jnp.float32,
                               minval=-bound, maxval=bound)
        b = jax.random.uniform(kb, (fan_out, 1), jnp.float32,
                               minval=-bound, maxval=bound)
        return w, b

    w1, b1 = linear(ks[0], ks[1], OBS_DIM, H1)
    w2, b2 = linear(ks[2], ks[3], H1, H2)
    w3, b3 = linear(ks[4], ks[5], H2, NUM_ACT)
    return (w1, b1, w2, b2, w3, b3)


if __name__ == "__main__":
    key = jax.random.PRNGKey(0)
    k_x, k_x2, k_p = jax.random.split(key, 3)

    params = init_params(k_p)

    # Small-shape check (B=8): force the Pallas path so the kernel runs.
    B = 8
    x = jax.random.normal(k_x, (B, OBS_DIM), jnp.float32)
    out = jax.block_until_ready(cartpole_forward(x, params, force_pallas=True))
    ref = _reference_forward(x, params)
    assert out.shape == (B, NUM_ACT)
    assert jnp.allclose(out, ref, atol=5e-5, rtol=1e-4), (
        float(jnp.max(jnp.abs(out - ref))))

    # Multi-tile check: exercises lane padding + a 2-step "parallel" grid.
    B2 = 300
    x2 = jax.random.normal(k_x2, (B2, OBS_DIM), jnp.float32)
    out2 = jax.block_until_ready(
        cartpole_forward(x2, params, force_pallas=True))
    ref2 = _reference_forward(x2, params)
    assert out2.shape == (B2, NUM_ACT)
    assert jnp.allclose(out2, ref2, atol=5e-5, rtol=1e-4), (
        float(jnp.max(jnp.abs(out2 - ref2))))

    # Default dispatch at small B takes the fused XLA path.
    out3 = jax.block_until_ready(cartpole_forward(x, params))
    assert jnp.allclose(out3, ref, atol=1e-5, rtol=1e-5)

    print("KERNEL_OK")
</pallas_src>

<mosaic_0001>
module attributes {stable_mosaic.version = 11 : i64} {
  func.func @_mlp_logits_kernel(%arg0: i32, %arg1: memref<4x128xf32, #tpu.memory_space<vmem>>, %arg2: memref<64x4xf32, #tpu.memory_space<vmem>>, %arg3: memref<64x1xf32, #tpu.memory_space<vmem>>, %arg4: memref<30x64xf32, #tpu.memory_space<vmem>>, %arg5: memref<30x1xf32, #tpu.memory_space<vmem>>, %arg6: memref<2x30xf32, #tpu.memory_space<vmem>>, %arg7: memref<2x1xf32, #tpu.memory_space<vmem>>, %arg8: memref<2x128xf32, #tpu.memory_space<vmem>>) attributes {dimension_semantics = [#tpu.dimension_semantics<parallel>], iteration_bounds = array<i64: 1>, scalar_prefetch = 0 : i64, scratch_operands = 0 : i64, tpu.core_type = #tpu.core_type<tc>, window_params = [{transform_indices = @transform_0, window_bounds = array<i64: 4, 128>}, {pipeline_mode = #tpu.pipeline_mode<synchronous>, transform_indices = @transform_1, window_bounds = array<i64: 64, 4>}, {pipeline_mode = #tpu.pipeline_mode<synchronous>, transform_indices = @transform_2, window_bounds = array<i64: 64, 1>}, {pipeline_mode = #tpu.pipeline_mode<synchronous>, transform_indices = @transform_3, window_bounds = array<i64: 30, 64>}, {pipeline_mode = #tpu.pipeline_mode<synchronous>, transform_indices = @transform_4, window_bounds = array<i64: 30, 1>}, {pipeline_mode = #tpu.pipeline_mode<synchronous>, transform_indices = @transform_5, window_bounds = array<i64: 2, 30>}, {pipeline_mode = #tpu.pipeline_mode<synchronous>, transform_indices = @transform_6, window_bounds = array<i64: 2, 1>}, {transform_indices = @transform_7, window_bounds = array<i64: 2, 128>}]} {
    %c0 = arith.constant 0 : index
    %c0_0 = arith.constant 0 : index
    %0 = vector.load %arg1[%c0, %c0_0] : memref<4x128xf32, #tpu.memory_space<vmem>>, vector<4x128xf32>
    %c0_1 = arith.constant 0 : index
    %c0_2 = arith.constant 0 : index
    %1 = vector.load %arg2[%c0_1, %c0_2] : memref<64x4xf32, #tpu.memory_space<vmem>>, vector<64x4xf32>
    %c0_3 = arith.constant 0 : index
    %c0_4 = arith.constant 0 : index
    %2 = vector.load %arg3[%c0_3, %c0_4] : memref<64x1xf32, #tpu.memory_space<vmem>>, vector<64x1xf32>
    %3 = vector.extract_strided_slice %1 {offsets = [0, 0], sizes = [64, 1], strides = [1, 1]} : vector<64x4xf32> to vector<64x1xf32>
    %4 = vector.extract_strided_slice %0 {offsets = [0, 0], sizes = [1, 128], strides = [1, 1]} : vector<4x128xf32> to vector<1x128xf32>
    %5 = vector.broadcast %3 : vector<64x1xf32> to vector<64x128xf32>
    %6 = vector.broadcast %4 : vector<1x128xf32> to vector<64x128xf32>
    %7 = arith.mulf %5, %6 : vector<64x128xf32>
    %8 = vector.broadcast %2 : vector<64x1xf32> to vector<64x128xf32>
    %9 = arith.addf %8, %7 : vector<64x128xf32>
    %10 = vector.extract_strided_slice %1 {offsets = [0, 1], sizes = [64, 1], strides = [1, 1]} : vector<64x4xf32> to vector<64x1xf32>
    %11 = vector.extract_strided_slice %0 {offsets = [1, 0], sizes = [1, 128], strides = [1, 1]} : vector<4x128xf32> to vector<1x128xf32>
    %12 = vector.broadcast %10 : vector<64x1xf32> to vector<64x128xf32>
    %13 = vector.broadcast %11 : vector<1x128xf32> to vector<64x128xf32>
    %14 = arith.mulf %12, %13 : vector<64x128xf32>
    %15 = arith.addf %9, %14 : vector<64x128xf32>
    %16 = vector.extract_strided_slice %1 {offsets = [0, 2], sizes = [64, 1], strides = [1, 1]} : vector<64x4xf32> to vector<64x1xf32>
    %17 = vector.extract_strided_slice %0 {offsets = [2, 0], sizes = [1, 128], strides = [1, 1]} : vector<4x128xf32> to vector<1x128xf32>
    %18 = vector.broadcast %16 : vector<64x1xf32> to vector<64x128xf32>
    %19 = vector.broadcast %17 : vector<1x128xf32> to vector<64x128xf32>
    %20 = arith.mulf %18, %19 : vector<64x128xf32>
    %21 = arith.addf %15, %20 : vector<64x128xf32>
    %22 = vector.extract_strided_slice %1 {offsets = [0, 3], sizes = [64, 1], strides = [1, 1]} : vector<64x4xf32> to vector<64x1xf32>
    %23 = vector.extract_strided_slice %0 {offsets = [3, 0], sizes = [1, 128], strides = [1, 1]} : vector<4x128xf32> to vector<1x128xf32>
    %24 = vector.broadcast %22 : vector<64x1xf32> to vector<64x128xf32>
    %25 = vector.broadcast %23 : vector<1x128xf32> to vector<64x128xf32>
    %26 = arith.mulf %24, %25 : vector<64x128xf32>
    %27 = arith.addf %21, %26 : vector<64x128xf32>
    %28 = math.tanh %27 : vector<64x128xf32>
    %c0_5 = arith.constant 0 : index
    %c0_6 = arith.constant 0 : index
    %29 = vector.load %arg4[%c0_5, %c0_6] : memref<30x64xf32, #tpu.memory_space<vmem>>, vector<30x64xf32>
    %cst = arith.constant dense<0.000000e+00> : vector<30x128xf32>
    %30 = tpu.matmul %29, %28, %cst {dimension_numbers = #tpu.dot_dimension_numbers<[1], [0], [0], [1], [0, 0, 1, 1], [], []>} : vector<30x64xf32>, vector<64x128xf32>, vector<30x128xf32> -> vector<30x128xf32>
    %c0_7 = arith.constant 0 : index
    %c0_8 = arith.constant 0 : index
    %31 = vector.load %arg5[%c0_7, %c0_8] : memref<30x1xf32, #tpu.memory_space<vmem>>, vector<30x1xf32>
    %32 = vector.broadcast %31 : vector<30x1xf32> to vector<30x128xf32>
    %33 = arith.addf %30, %32 : vector<30x128xf32>
    %34 = math.tanh %33 : vector<30x128xf32>
    %c0_9 = arith.constant 0 : index
    %c0_10 = arith.constant 0 : index
    %35 = vector.load %arg6[%c0_9, %c0_10] : memref<2x30xf32, #tpu.memory_space<vmem>>, vector<2x30xf32>
    %cst_11 = arith.constant dense<0.000000e+00> : vector<2x128xf32>
    %36 = tpu.matmul %35, %34, %cst_11 {dimension_numbers = #tpu.dot_dimension_numbers<[1], [0], [0], [1], [0, 0, 1, 1], [], []>} : vector<2x30xf32>, vector<30x128xf32>, vector<2x128xf32> -> vector<2x128xf32>
    %c0_12 = arith.constant 0 : index
    %c0_13 = arith.constant 0 : index
    %37 = vector.load %arg7[%c0_12, %c0_13] : memref<2x1xf32, #tpu.memory_space<vmem>>, vector<2x1xf32>
    %38 = vector.broadcast %37 : vector<2x1xf32> to vector<2x128xf32>
    %39 = arith.addf %36, %38 : vector<2x128xf32>
    %c0_14 = arith.constant 0 : index
    %c0_15 = arith.constant 0 : index
    %40 = vector.load %arg8[%c0_14, %c0_15] : memref<2x128xf32, #tpu.memory_space<vmem>>, vector<2x128xf32>
    tpu.vector_store %arg8[%c0_14, %c0_15], %39 {strides = array<i32>} : memref<2x128xf32, #tpu.memory_space<vmem>>, vector<2x128xf32>,
    return
  }
  func.func @transform_0(%arg0: i32) -> (i32, i32) {
    %c0_i32 = arith.constant 0 : i32
    %c0_i32_0 = arith.constant 0 : i32
    return %c0_i32, %arg0 : i32, i32
  }
  func.func @transform_1(%arg0: i32) -> (i32, i32) {
    %c0_i32 = arith.constant 0 : i32
    %c0_i32_0 = arith.constant 0 : i32
    %c0_i32_1 = arith.constant 0 : i32
    return %c0_i32, %c0_i32_0 : i32, i32
  }
  func.func @transform_2(%arg0: i32) -> (i32, i32) {
    %c0_i32 = arith.constant 0 : i32
    %c0_i32_0 = arith.constant 0 : i32
    %c0_i32_1 = arith.constant 0 : i32
    return %c0_i32, %c0_i32_0 : i32, i32
  }
  func.func @transform_3(%arg0: i32) -> (i32, i32) {
    %c0_i32 = arith.constant 0 : i32
    %c0_i32_0 = arith.constant 0 : i32
    %c0_i32_1 = arith.constant 0 : i32
    return %c0_i32, %c0_i32_0 : i32, i32
  }
  func.func @transform_4(%arg0: i32) -> (i32, i32) {
    %c0_i32 = arith.constant 0 : i32
    %c0_i32_0 = arith.constant 0 : i32
    %c0_i32_1 = arith.constant 0 : i32
    return %c0_i32, %c0_i32_0 : i32, i32
  }
  func.func @transform_5(%arg0: i32) -> (i32, i32) {
    %c0_i32 = arith.constant 0 : i32
    %c0_i32_0 = arith.constant 0 : i32
    %c0_i32_1 = arith.constant 0 : i32
    return %c0_i32, %c0_i32_0 : i32, i32
  }
  func.func @transform_6(%arg0: i32) -> (i32, i32) {
    %c0_i32 = arith.constant 0 : i32
    %c0_i32_0 = arith.constant 0 : i32
    %c0_i32_1 = arith.constant 0 : i32
    return %c0_i32, %c0_i32_0 : i32, i32
  }
  func.func @transform_7(%arg0: i32) -> (i32, i32) {
    %c0_i32 = arith.constant 0 : i32
    %c0_i32_0 = arith.constant 0 : i32
    return %c0_i32, %arg0 : i32, i32
  }
}

</mosaic_0001>

<bundles_post_ra>
// kernel: cartpole_forward.1
= control target key start
LH: loop header
LB: loop body
LE: loop exit
PB: predicated region body
PF: predicated region fallthrough
CT: control target
= control target key end

     0   :  { %v663_v0 = vmov 2   ;;  %v664_v1 = vmov 0   ;;  %v665_v7 = vmov 1   ;;  %v666_v14 = vmov 3   ;;  %s869_s2 = inlined_call_operand.vmem [shape: f32[64,1], index: 2, kind: input, shape index: {}]   ;;  %s870_s1 = inlined_call_operand.vmem [shape: f32[64,4], index: 1, kind: input, shape index: {}]   ;;  %s871_s3 = inlined_call_operand.vmem [shape: f32[30,64], index: 3, kind: input, shape index: {}]   ;;  %s872_s4 = inlined_call_operand.vmem [shape: f32[30,1], index: 4, kind: input, shape index: {}]   ;;  %s873_s6 = inlined_call_operand.vmem [shape: f32[2,1], index: 6, kind: input, shape index: {}]   ;;  %s874_s0 = inlined_call_operand.vmem [shape: f32[4,128], index: 0, kind: input, shape index: {}]   ;;  %s875_s5 = inlined_call_operand.vmem [shape: f32[2,30], index: 5, kind: input, shape index: {}]   ;;  %s876_s7 = inlined_call_operand.vmem [shape: f32[2,128], index: 7, kind: output, shape index: {}]  }
   0x1   :  { %622 = vset.pattern.permute.xlu0 %v663_v0  ;;  %614 = vset.pattern.permute.xlu1 %v664_v1  ;;  %v35_v2 = vld [vmem:[%s869_s2] sm:$0xff]  ;;  %v29_v3 = vld [vmem:[%s870_s1 + $0x10] sm:$0xff]  ;;  %v36_v4 = vld [vmem:[%s869_s2 + $0x8] sm:$0xff]  ;;  %vm335_vm0 = vcmask 523264   ;;  %v83_v33 = vlaneseq  ;;  %vm668_vm1 = vmmov 0   ;;  %vm448_vm2 = vcmask 1045504  }
   0x2   :  { %97 = vperm.xlu1 %614, %v35_v2   ;;  %204 = vperm.xlu0 %622, %v29_v3   ;;  %v27_v5 = vld [vmem:[%s870_s1] sm:$0xff]  ;;  %v28_v6 = vld [vmem:[%s870_s1 + $0x8] sm:$0xff]  ;;  %v30_v8 = vld [vmem:[%s870_s1 + $0x18] sm:$0xff]  ;;  %vm670_vm3 = vmmov 1   ;;  %vm444_vm5 = vcmask 244736  }
   0x3   :  { %v37_v9 = vld [vmem:[%s869_s2 + $0x10] sm:$0xff]  ;;  %v40_v10 = vld [vmem:[%s869_s2 + $0x28] sm:$0xff]  ;;  %v34_v11 = vld [vmem:[%s870_s1 + $0x38] sm:$0xff]  ;;  %v84_v37 = vshrl.u32 %v83_v33, 7 }
   0x4   :  { %v38_v12 = vld [vmem:[%s869_s2 + $0x18] sm:$0xff]  ;;  %v41_v13 = vld [vmem:[%s869_s2 + $0x30] sm:$0xff]  ;;  %v31_v16 = vld [vmem:[%s870_s1 + $0x20] sm:$0xff] }
   0x5   :  { %v33_v15 = vld [vmem:[%s870_s1 + $0x30] sm:$0xff]  ;;  %v32_v17 = vld [vmem:[%s870_s1 + $0x28] sm:$0xff]  ;;  %v39_v18 = vld [vmem:[%s869_s2 + $0x20] sm:$0xff]  ;;  %v85_v40 = vsub.s32 0, %v84_v37  ;;  %v177_v45 = vsub.s32 1, %v84_v37  ;;  %v229_v47 = vsub.s32 2, %v84_v37 }
   0x6   :  { %102 = vperm.xlu1 %614, %v36_v4   ;;  %623 = vset.pattern.permute.xlu0 %v664_v1  ;;  %v42_v19 = vld [vmem:[%s869_s2 + $0x38] sm:$0xff]  ;;  %v307_v24 = vld [vmem:[%s871_s3] sm:$0xff]  ;;  %v312_v28 = vld [vmem:[%s872_s4 + $0x8] sm:$0xff]  ;;  %v281_v53 = vsub.s32 3, %v84_v37 }
   0x7   :  { %45 = vperm.xlu0 %623, %v27_v5   ;;  %566 = vmatprep.mubr.msk.f32.mxu0 %vm335_vm0, %v307_v24  ;;  %v311_v29 = vld [vmem:[%s872_s4] sm:$0xff]  ;;  %v313_v31 = vld [vmem:[%s872_s4 + $0x10] sm:$0xff]  ;;  %v314_v32 = vld [vmem:[%s872_s4 + $0x18] sm:$0x3f] }
   0x8   :  { %v438_v36 = vld [vmem:[%s873_s6] sm:$0x3]  ;;  %vm604_vm4 = vmpackc.low %vm448_vm2, %vm670_vm3 }
   0x9   :  { %v26_v42 = vld [vmem:[%s874_s0] sm:$0xf] }
   0xa   :  { %615 = vset.pattern.permute.xlu1 %v665_v7  ;;  %v804_v44 = vrot.slane %v26_v42, %v85_v40  ;;  %v809_v49 = vrot.slane %v26_v42, %v177_v45  ;;  %v812_v54 = vrot.slane %v26_v42, %v229_v47  ;;  %v815_v60 = vrot.slane %v26_v42, %v281_v53 }
   0xb   :  { %148 = vperm.xlu1 %615, %v28_v6   ;;  %50 = vperm.xlu0 %623, %v28_v6  }
   0xf   :  { %616 = vset.pattern.permute.xlu1 %v664_v1  ;;  %60 = vperm.xlu0 %623, %v30_v8  }
  0x10   :  { %55 = vperm.xlu1 %616, %v29_v3  }
  0x13   :  { %107 = vperm.xlu0 %623, %v37_v9  }
  0x14   :  { %617 = vset.pattern.permute.xlu1 %v663_v0 }
  0x15   :  { %196 = vperm.xlu1 %617, %v27_v5  }
  0x17   :  { %122 = vperm.xlu0 %623, %v40_v10  }
  0x19   :  { %200 = vperm.xlu1 %617, %v28_v6  }
  0x1b   :  { %80 = vperm.xlu0 %623, %v34_v11  }
  0x1d   :  { %618 = vset.pattern.permute.xlu1 %v664_v1 }
  0x1e   :  { %112 = vperm.xlu1 %618, %v38_v12  }
  0x1f   :  { %127 = vperm.xlu0 %623, %v41_v13  }
  0x22   :  { %619 = vset.pattern.permute.xlu1 %v665_v7 }
  0x23   :  { %630 = vset.pattern.permute.xlu0 %v665_v7  ;;  %156 = vperm.xlu1 %619, %v30_v8  }
  0x24   :  { %144 = vperm.xlu0 %630, %v27_v5  }
  0x27   :  { %620 = vset.pattern.permute.xlu1 %v666_v14 }
  0x28   :  { %152 = vperm.xlu0 %630, %v29_v3   ;;  %248 = vperm.xlu1 %620, %v27_v5  }
  0x2c   :  { %168 = vperm.xlu0 %630, %v33_v15   ;;  %621 = vset.pattern.permute.xlu1 %v664_v1 }
  0x2d   :  { %65 = vperm.xlu1 %621, %v31_v16  }
  0x30   :  { %632 = vset.pattern.permute.xlu0 %v666_v14 }
  0x31   :  { %252 = vperm.xlu0 %632, %v28_v6   ;;  %70 = vperm.xlu1 %621, %v32_v17  }
  0x35   :  { %256 = vperm.xlu0 %632, %v29_v3   ;;  %624 = vset.pattern.permute.xlu1 %v663_v0 }
  0x36   :  { %208 = vperm.xlu1 %624, %v30_v8  }
  0x39   :  { %268 = vperm.xlu0 %632, %v32_v17  }
  0x3a   :  { %625 = vset.pattern.permute.xlu1 %v664_v1 }
  0x3b   :  { %117 = vperm.xlu1 %625, %v39_v18  }
  0x3d   :  { %272 = vperm.xlu0 %632, %v33_v15  }
  0x3f   :  { %626 = vset.pattern.permute.xlu1 %v665_v7 }
  0x40   :  { %160 = vperm.xlu1 %626, %v31_v16  }
  0x41   :  { %637 = vset.pattern.permute.xlu0 %v664_v1 }
  0x42   :  { %317 = vperm.xlu0 %637, %v311_v29  }
  0x44   :  { %164 = vperm.xlu1 %626, %v32_v17  }
  0x46   :  { %332 = vperm.xlu0 %637, %v314_v32  }
  0x48   :  { %627 = vset.pattern.permute.xlu1 %v666_v14 }
  0x49   :  { %260 = vperm.xlu1 %627, %v30_v8  }
  0x4d   :  { %628 = vset.pattern.permute.xlu1 %v664_v1 }
  0x4e   :  { %75 = vperm.xlu1 %628, %v33_v15  }
  0x52   :  { %629 = vset.pattern.permute.xlu1 %v663_v0 }
  0x53   :  { %212 = vperm.xlu1 %629, %v31_v16  }
  0x57   :  { %216 = vperm.xlu1 %629, %v32_v17  }
  0x5b   :  { %631 = vset.pattern.permute.xlu1 %v664_v1 }
  0x5c   :  { %132 = vperm.xlu1 %631, %v42_v19  }
  0x60   :  { %633 = vset.pattern.permute.xlu1 %v665_v7 }
  0x61   :  { %172 = vperm.xlu1 %633, %v34_v11  }
  0x65   :  { %634 = vset.pattern.permute.xlu1 %v666_v14 }
  0x66   :  { %264 = vperm.xlu1 %634, %v31_v16  }
  0x6a   :  { %635 = vset.pattern.permute.xlu1 %v663_v0 }
  0x6b   :  { %220 = vperm.xlu1 %635, %v33_v15  }
  0x6f   :  { %224 = vperm.xlu1 %635, %v34_v11  }
  0x73   :  { %636 = vset.pattern.permute.xlu1 %v666_v14 }
  0x74   :  { %276 = vperm.xlu1 %636, %v34_v11  }
  0x78   :  { %638 = vset.pattern.permute.xlu1 %v664_v1 }
  0x79   :  { %322 = vperm.xlu1 %638, %v312_v28  }
  0x7d   :  { %327 = vperm.xlu1 %638, %v313_v31  }
  0x81   :  { %v98_v20 = vpop.permute.xlu1 %97  ;;  %v774_v21 = vpop.permute.xlu0 %204  ;;  %441 = vperm.xlu1 %638, %v438_v36  }
  0x82   :  { %v233_v24 = vmul.f32 %v812_v54, %v774_v21 }
  0x85   :  { %v103_v22 = vpop.permute.xlu1 %102 }
  0x86   :  { %v46_v23 = vpop.permute.xlu0 %45 }
  0x87   :  { %v87_v48 = vmul.f32 %v804_v44, %v46_v23 }
  0x89   :  { %v135_v55 = vadd.f32 %v98_v20, %v87_v48 }
  0x8a   :  { %v149_v25 = vpop.permute.xlu1 %148  ;;  %v51_v26 = vpop.permute.xlu0 %50 }
  0x8b   :  { %v88_v56 = vmul.f32 %v804_v44, %v51_v26  ;;  %v180_v3 = vmul.f32 %v809_v49, %v149_v25 }
  0x8d   :  { %v136_v62 = vadd.f32 %v103_v22, %v88_v56 }
  0x8e   :  { %v780_v27 = vpop.permute.xlu0 %60 }
  0x8f   :  { %v56_v30 = vpop.permute.xlu1 %55  ;;  %v188_v5 = vadd.f32 %v180_v3, %v136_v62  ;;  %v90_v22 = vmul.f32 %v804_v44, %v780_v27 }
  0x90   :  { %v89_v14 = vmul.f32 %v804_v44, %v56_v30 }
  0x92   :  { %v108_v34 = vpop.permute.xlu0 %107 }
  0x93   :  { %v137_v19 = vadd.f32 %v108_v34, %v89_v14 }
  0x94   :  { %v197_v35 = vpop.permute.xlu1 %196 }
  0x95   :  { %v231_v61 = vmul.f32 %v812_v54, %v197_v35 }
  0x96   :  { %v797_v38 = vpop.permute.xlu0 %122 }
  0x98   :  { %v201_v39 = vpop.permute.xlu1 %200 }
  0x99   :  { %v232_v4 = vmul.f32 %v812_v54, %v201_v39 }
  0x9a   :  { %v799_v41 = vpop.permute.xlu0 %80 }
  0x9b   :  { %v240_v9 = vadd.f32 %v232_v4, %v188_v5 }
  0x9d   :  { %v113_v43 = vpop.permute.xlu1 %112 }
  0x9e   :  { %v806_v46 = vpop.permute.xlu0 %127  ;;  %v138_v30 = vadd.f32 %v113_v43, %v90_v22 }
  0xa2   :  { %v157_v50 = vpop.permute.xlu1 %156 }
  0xa3   :  { %v145_v51 = vpop.permute.xlu0 %144  ;;  %v182_v26 = vmul.f32 %v809_v49, %v157_v50 }
  0xa4   :  { %v179_v52 = vmul.f32 %v809_v49, %v145_v51 }
  0xa5   :  { %v190_v33 = vadd.f32 %v182_v26, %v138_v30  ;;  %v667_v30 = vmov 0.0|0.0  }
  0xa6   :  { %v187_v59 = vadd.f32 %v179_v52, %v135_v55  ;;  %599 = vmatprep.subr.bf16.mxu1 %v667_v30 }
  0xa7   :  { %v153_v57 = vpop.permute.xlu0 %152  ;;  %v249_v58 = vpop.permute.xlu1 %248 }
  0xa8   :  { %v239_v0 = vadd.f32 %v231_v61, %v187_v59  ;;  %v283_v1 = vmul.f32 %v815_v60, %v249_v58  ;;  %v181_v16 = vmul.f32 %v809_v49, %v153_v57 }
  0xaa   :  { %v291_v6 = vadd.f32 %v283_v1, %v239_v0  ;;  %v189_v25 = vadd.f32 %v181_v16, %v137_v19 }
  0xab   :  { %v169_v63 = vpop.permute.xlu0 %168 }
  0xac   :  { %v66_v2 = vpop.permute.xlu1 %65  ;;  %639 = vtanh.f32 %v291_v6  ;;  %v241_v32 = vadd.f32 %v233_v24, %v189_v25  ;;  %v185_v39 = vmul.f32 %v809_v49, %v169_v63 }
  0xb0   :  { %v253_v7 = vpop.permute.xlu0 %252  ;;  %v71_v8 = vpop.permute.xlu1 %70 }
  0xb1   :  { %v284_v10 = vmul.f32 %v815_v60, %v253_v7  ;;  %v92_v52 = vmul.f32 %v804_v44, %v71_v8 }
  0xb3   :  { %v292_v11 = vadd.f32 %v284_v10, %v240_v9  ;;  %v140_v56 = vadd.f32 %v797_v38, %v92_v52  ;;  %v94_v10 = vmul.f32 %v804_v44, %v799_v41 }
  0xb4   :  { %v257_v23 = vpop.permute.xlu0 %256 }
  0xb5   :  { %641 = vtanh.f32 %v292_v11  ;;  %v209_v12 = vpop.permute.xlu1 %208  ;;  %v285_v29 = vmul.f32 %v815_v60, %v257_v23 }
  0xb6   :  { %v640_v15 = vpop.eup %639  ;;  %v234_v31 = vmul.f32 %v812_v54, %v209_v12 }
  0xb7   :  { %v293_v34 = vadd.f32 %v285_v29, %v241_v32  ;;  %v309_v29 = vld [vmem:[%s871_s3 + $0x10] sm:$0xff] }
  0xb8   :  { %v242_v27 = vadd.f32 %v234_v31, %v190_v33  ;;  %v269_v58 = vpop.permute.xlu0 %268  ;;  %v669_v31 = vmov 0.0  }
  0xb9   :  { %643 = vtanh.f32 %v293_v34  ;;  %v288_v0 = vmul.f32 %v815_v60, %v269_v58  ;;  %580 = vmatprep.mubr.msk.f32.mxu1 %vm668_vm1, %v669_v31 }
  0xba   :  { %v118_v13 = vpop.permute.xlu1 %117 }
  0xbc   :  { %v273_v12 = vpop.permute.xlu0 %272 }
  0xbf   :  { %v642_v17 = vpop.eup %641  ;;  %v161_v18 = vpop.permute.xlu1 %160 }
  0xc0   :  { %v583_v20 = vpack.c.bf16 %v642_v17, %v640_v15  ;;  %v183_v61 = vmul.f32 %v809_v49, %v161_v18  ;;  %v289_v17 = vmul.f32 %v815_v60, %v273_v12 }
  0xc1   :  { %v318_v32 = vpop.permute.xlu0 %317 }
  0xc2   :  { %584 = vmatprep.subr.bf16.mxu0 %v583_v20 }
  0xc3   :  { %v165_v28 = vpop.permute.xlu1 %164  ;;  %586 = vmatpush3.bf16.msra.mxu0 %v583_v20  ;;  %v644_v47 = vpop.eup %643 }
  0xc4   :  { %v184_v53 = vmul.f32 %v809_v49, %v165_v28 }
  0xc6   :  { %v192_v59 = vadd.f32 %v184_v53, %v140_v56  ;;  %v437_v53 = vld [vmem:[%s875_s5] sm:$0x3] }
  0xc8   :  { %v261_v35 = vpop.permute.xlu1 %260 }
  0xc9   :  { %v286_v36 = vmul.f32 %v815_v60, %v261_v35 }
  0xcb   :  { %v294_v37 = vadd.f32 %v286_v36, %v242_v27 }
  0xcd   :  { %645 = vtanh.f32 %v294_v37  ;;  %v76_v21 = vpop.permute.xlu1 %75  ;;  %v333_v37 = vpop.permute.xlu0 %332 }
  0xce   :  { %v93_v40 = vmul.f32 %v804_v44, %v76_v21 }
  0xd0   :  { %v141_v42 = vadd.f32 %v806_v46, %v93_v40  ;;  %v91_v46 = vmul.f32 %v804_v44, %v66_v2 }
  0xd2   :  { %v213_v43 = vpop.permute.xlu1 %212  ;;  %v193_v45 = vadd.f32 %v185_v39, %v141_v42  ;;  %v139_v1 = vadd.f32 %v118_v13, %v91_v46 }
  0xd3   :  { %v235_v3 = vmul.f32 %v812_v54, %v213_v43 }
  0xd4   :  { %v191_v4 = vadd.f32 %v183_v61, %v139_v1 }
  0xd6   :  { %v217_v48 = vpop.permute.xlu1 %216  ;;  %v243_v7 = vadd.f32 %v235_v3, %v191_v4 }
  0xd7   :  { %v646_v50 = vpop.eup %645  ;;  %v236_v57 = vmul.f32 %v812_v54, %v217_v48 }
  0xd8   :  { %v587_v51 = vpack.c.bf16 %v646_v50, %v644_v47 }
  0xd9   :  { %v244_v63 = vadd.f32 %v236_v57, %v192_v59 }
  0xda   :  { %588 = vmatprep.subr.bf16.mxu0 %v587_v51 }
  0xdb   :  { %v133_v55 = vpop.permute.xlu1 %132  ;;  %590 = vmatpush3.bf16.msra.mxu0 %v587_v51  ;;  %v296_v5 = vadd.f32 %v288_v0, %v244_v63 }
  0xdc   :  { %v142_v15 = vadd.f32 %v133_v55, %v94_v10 }
  0xdd   :  { %647 = vtanh.f32 %v296_v5 }
  0xe0   :  { %v173_v62 = vpop.permute.xlu1 %172 }
  0xe1   :  { %v186_v11 = vmul.f32 %v809_v49, %v173_v62 }
  0xe3   :  { %v194_v18 = vadd.f32 %v186_v11, %v142_v15 }
  0xe5   :  { %v265_v6 = vpop.permute.xlu1 %264 }
  0xe6   :  { %v287_v38 = vmul.f32 %v815_v60, %v265_v6 }
  0xe7   :  { %v648_v19 = vpop.eup %647 }
  0xe8   :  { %v295_v8 = vadd.f32 %v287_v38, %v243_v7 }
  0xea   :  { %649 = vtanh.f32 %v295_v8  ;;  %v221_v9 = vpop.permute.xlu1 %220 }
  0xeb   :  { %v237_v2 = vmul.f32 %v812_v54, %v221_v9 }
  0xed   :  { %v245_v14 = vadd.f32 %v237_v2, %v193_v45 }
  0xee   :  { %v225_v13 = vpop.permute.xlu1 %224 }
  0xef   :  { %v238_v16 = vmul.f32 %v812_v54, %v225_v13  ;;  %v297_v20 = vadd.f32 %v289_v17, %v245_v14  ;;  %v308_v54 = vld [vmem:[%s871_s3 + $0x8] sm:$0xff] }
  0xf1   :  { %v246_v24 = vadd.f32 %v238_v16, %v194_v18  ;;  %651 = vtanh.f32 %v297_v20 }
  0xf3   :  { %v277_v22 = vpop.permute.xlu1 %276 }
  0xf4   :  { %v650_v23 = vpop.eup %649  ;;  %v290_v25 = vmul.f32 %v815_v60, %v277_v22  ;;  %v310_v60 = vld [vmem:[%s871_s3 + $0x18] sm:$0x3f] }
  0xf5   :  { %v591_v26 = vpack.c.bf16 %v648_v19, %v650_v23 }
  0xf6   :  { %v298_v41 = vadd.f32 %v290_v25, %v246_v24 }
  0xf7   :  { %592 = vmatprep.subr.bf16.mxu0 %v591_v26 }
  0xf8   :  { %653 = vtanh.f32 %v298_v41  ;;  %594 = vmatpush3.bf16.msra.mxu0 %v591_v26  ;;  %v323_v33 = vpop.permute.xlu1 %322 }
  0xfb   :  { %v652_v44 = vpop.eup %651 }
  0xfc   :  { %v328_v39 = vpop.permute.xlu1 %327 }
 0x100   :  { %v442_v55 = vpop.permute.xlu1 %441 }
 0x102   :  { %v654_v49 = vpop.eup %653 }
 0x103   :  { %v595_v28 = vpack.c.bf16 %v654_v49, %v652_v44 }
 0x105   :  { %596 = vmatprep.subr.bf16.mxu0 %v595_v28 }
 0x106   :  { %598 = vmatpush3.bf16.msra.mxu0 %v595_v28 }
 0x109   :  { %567 = vmatmul.mubr.msk.f32.vlgmr.msra.gmra.mrb[0].mxu0 %vm335_vm0, %v308_v54 }
 0x10a   :  { %569 = vmatprep.mubr.msk.f32.mxu0 %vm335_vm0, %v309_v29 }
 0x10d   :  { %570 = vmatmul.mubr.msk.f32.gmra.mrb[2].mxu0 %vm335_vm0, %v310_v60 }
 0x1dc   :  { %v568_v34 = vpop.f32.mrb[0].mxu0 }
 0x1dd   :  { %v420_v35 = vadd.f32 %v568_v34, %v323_v33  ;;  %v414_v27 = vpop.f32.mrb[1].mxu0 }
 0x1de   :  { %v415_v36 = vadd.f32 %v414_v27, %v318_v32 }
 0x1df   :  { %655 = vtanh.f32 %v420_v35 }
 0x1e0   :  { %657 = vtanh.f32 %v415_v36  ;;  %v571_v21 = vpop.f32.mrb[2].mxu0 }
 0x1e1   :  { %v430_v40 = vadd.f32 %v571_v21, %v333_v37  ;;  %v424_v42 = vpop.f32.mrb[3].mxu0 }
 0x1e2   :  { %v425_v43 = vadd.f32 %v424_v42, %v328_v39 }
 0x1e3   :  { %659 = vtanh.f32 %v430_v40 }
 0x1e4   :  { %661 = vtanh.f32 %v425_v43 }
 0x1e9   :  { %v656_v45 = vpop.eup %655 }
 0x1ea   :  { %v658_v47 = vpop.eup %657 }
 0x1eb   :  { %v600_v48 = vpack.c.bf16 %v656_v45, %v658_v47 }
 0x1ed   :  { %v660_v50 = vpop.eup %659  ;;  %601 = vmatpush3.bf16.msra.mxu1 %v600_v48 }
 0x1ee   :  { %v662_v51 = vpop.eup %661  ;;  %602 = vmatprep.subr.bf16.mxu1 %v667_v30 }
 0x1ef   :  { %v603_v52 = vpack.c.bf16 %v660_v50, %v662_v51 }
 0x1f1   :  { %605 = vmatpush3.bf16.msk.msra.mxu1 %vm604_vm4, %v603_v52 }
 0x1f4   :  { %581 = vmatmul.mubr.msk.f32.vlgmr.msra.gmra.mrb[0].mxu1 %vm444_vm5, %v437_v53 }
 0x2c7   :  { %v518_v56 = vpop.f32.mrb[0].mxu1 }
 0x2c8   :  { %v519_v57 = vadd.f32 %v518_v56, %v442_v55  ;;  %v582_v58 = vpop.f32.mrb[1].mxu1 }
 0x2ca   :  { %522 = vst [vmem:[%s876_s7] sm:$0x3] %v519_v57 }

</bundles_post_ra>
